<compile_context>
chip_gen: v6e
topology: v6e:2x2x1
jax: 0.10.0
libtpu: 0.0.40
codegen_flags: <defaults>
</compile_context>

<pallas_src>
import jax
import jax.numpy as jnp
import numpy as np
from jax.experimental import pallas as pl
from jax.experimental.pallas import tpu as pltpu

LEAK = 0.2
BN_EPS = 1e-5


def _leaky(x):
    return jnp.where(x >= 0, x, LEAK * x)


# ---------------------------------------------------------------------------
# Stage 1: per-channel sum / sum-of-squares of the pre-BatchNorm activations h2.
# Grid = (num_splits [parallel], tiles_per_split [arbitrary]); each split owns its
# own (1, ndf2, 1) accumulator row (megacore-safe).
# ---------------------------------------------------------------------------
def _stats_kernel(x_ref, w1_ref, b1_ref, w2_ref, sum_ref, sq_ref):
    i = pl.program_id(1)

    @pl.when(i == 0)
    def _():
        sum_ref[...] = jnp.zeros_like(sum_ref)
        sq_ref[...] = jnp.zeros_like(sq_ref)

    x = x_ref[...]                                                        # (C, TP)
    h1 = jnp.dot(w1_ref[...], x, preferred_element_type=jnp.float32)     # (ndf, TP)
    h1 = _leaky(h1 + b1_ref[...])                                         # f32 elementwise
    h2 = jnp.dot(w2_ref[...], h1.astype(w2_ref.dtype),
                 preferred_element_type=jnp.float32)                      # (ndf2, TP)

    sum_ref[...] += jnp.sum(h2, axis=1, keepdims=True)[None]              # (1, ndf2, 1)
    sq_ref[...] += jnp.sum(h2 * h2, axis=1, keepdims=True)[None]


# ---------------------------------------------------------------------------
# Stage 2: recompute h1/h2, apply folded BN (scale/shift) + LeakyReLU + final 1x1 conv.
# Output block is a lane-dense (1, tile_p) row.
# ---------------------------------------------------------------------------
def _forward_kernel(x_ref, w1_ref, b1_ref, w2_ref, scale_ref, shift_ref, w3_ref, out_ref):
    x = x_ref[...]                                                        # (C, TP)
    h1 = jnp.dot(w1_ref[...], x, preferred_element_type=jnp.float32)     # (ndf, TP)
    h1 = _leaky(h1 + b1_ref[...])
    h2 = jnp.dot(w2_ref[...], h1.astype(w2_ref.dtype),
                 preferred_element_type=jnp.float32)                      # (ndf2, TP)
    y = _leaky(h2 * scale_ref[...] + shift_ref[...])                      # f32
    out_ref[...] = jnp.dot(w3_ref[...], y.astype(w3_ref.dtype),
                           preferred_element_type=jnp.float32)            # (1, TP)


def _pick_tiling(P, tile_p, want_splits=2):
    assert P % 128 == 0, "N*H*W must be a multiple of 128"
    units = P // 128
    tu = max(1, min(tile_p // 128, units))
    while units % tu:
        tu -= 1
    tile_p = tu * 128
    n_blocks = units // tu
    num_splits = want_splits if n_blocks % want_splits == 0 else 1
    return tile_p, num_splits, n_blocks


def pixel_discriminator(x_nchw, params, *, tile_p=1024, compute_dtype=jnp.float32):
    """Forward pass of PixelDiscriminator. x_nchw: (N, C, H, W)."""
    N, C, H, W = x_nchw.shape
    P = N * H * W
    tile_p, num_splits, n_blocks = _pick_tiling(P, tile_p)
    tiles_per_split = n_blocks // num_splits

    w1 = params["w1"].astype(compute_dtype)            # (ndf, C)
    w2 = params["w2"].astype(compute_dtype)            # (ndf2, ndf)
    w3 = params["w3"].astype(compute_dtype)            # (1, ndf2)
    ndf, ndf2 = w1.shape[0], w2.shape[0]
    b1 = params["b1"].reshape(ndf, 1).astype(jnp.float32)

    # NCHW -> channel-major pixel matrix (C, P); pixel order is (N, H, W).
    x_cp = jnp.transpose(x_nchw, (1, 0, 2, 3)).reshape(C, P).astype(compute_dtype)

    # ---- Stage 1: BatchNorm2d training-mode batch statistics (per-split partials) ----
    sums, sqs = pl.pallas_call(
        _stats_kernel,
        out_shape=(
            jax.ShapeDtypeStruct((num_splits, ndf2, 1), jnp.float32),
            jax.ShapeDtypeStruct((num_splits, ndf2, 1), jnp.float32),
        ),
        grid_spec=pltpu.PrefetchScalarGridSpec(
            num_scalar_prefetch=0,
            grid=(num_splits, tiles_per_split),
            in_specs=[
                pl.BlockSpec((C, tile_p), lambda s, i: (0, s * tiles_per_split + i)),
                pl.BlockSpec((ndf, C), lambda s, i: (0, 0)),
                pl.BlockSpec((ndf, 1), lambda s, i: (0, 0)),
                pl.BlockSpec((ndf2, ndf), lambda s, i: (0, 0)),
            ],
            out_specs=[
                pl.BlockSpec((1, ndf2, 1), lambda s, i: (s, 0, 0)),
                pl.BlockSpec((1, ndf2, 1), lambda s, i: (s, 0, 0)),
            ],
        ),
        compiler_params=pltpu.CompilerParams(
            dimension_semantics=("parallel", "arbitrary"),
        ),
    )(x_cp, w1, b1, w2)

    # Tiny (num_splits, ndf2, 1) reductions + BN affine folding: plain JAX glue, f32.
    ch_sum = jnp.sum(sums, axis=0)                       # (ndf2, 1)
    ch_sq = jnp.sum(sqs, axis=0)                         # (ndf2, 1)
    mean = ch_sum / float(P)
    var = ch_sq / float(P) - mean * mean                 # biased variance (BN forward)
    invstd = jax.lax.rsqrt(var + BN_EPS)
    scale = params["gamma"].reshape(ndf2, 1).astype(jnp.float32) * invstd
    shift = params["beta"].reshape(ndf2, 1).astype(jnp.float32) - mean * scale

    # ---- Stage 2: recompute h1/h2 + BN + LeakyReLU + final 1x1 conv (lane-dense out) ----
    out_1p = pl.pallas_call(
        _forward_kernel,
        out_shape=jax.ShapeDtypeStruct((1, P), jnp.float32),
        grid_spec=pltpu.PrefetchScalarGridSpec(
            num_scalar_prefetch=0,
            grid=(n_blocks,),
            in_specs=[
                pl.BlockSpec((C, tile_p), lambda i: (0, i)),
                pl.BlockSpec((ndf, C), lambda i: (0, 0)),
                pl.BlockSpec((ndf, 1), lambda i: (0, 0)),
                pl.BlockSpec((ndf2, ndf), lambda i: (0, 0)),
                pl.BlockSpec((ndf2, 1), lambda i: (0, 0)),
                pl.BlockSpec((ndf2, 1), lambda i: (0, 0)),
                pl.BlockSpec((1, ndf2), lambda i: (0, 0)),
            ],
            out_specs=pl.BlockSpec((1, tile_p), lambda i: (0, i)),
        ),
        compiler_params=pltpu.CompilerParams(
            dimension_semantics=("parallel",),
        ),
    )(x_cp, w1, b1, w2, scale, shift, w3)

    # (1, P) -> (N, 1, H, W)
    return jnp.transpose(out_1p.reshape(1, N, H, W), (1, 0, 2, 3))


def init_params(key, input_nc, ndf=64):
    """Deterministic synthetic parameters matching the PyTorch module's shapes."""
    k1, k2, k3, k4 = jax.random.split(key, 4)
    ndf2 = ndf * 2
    return {
        "w1": jax.random.normal(k1, (ndf, input_nc), jnp.float32) * 0.1,   # Conv2d(C, ndf, 1)
        "b1": jax.random.normal(k2, (ndf,), jnp.float32) * 0.1,
        "w2": jax.random.normal(k3, (ndf2, ndf), jnp.float32) * 0.1,       # Conv2d(ndf, 2ndf, 1, bias=False)
        "gamma": jnp.ones((ndf2,), jnp.float32),                           # BatchNorm2d default init
        "beta": jnp.zeros((ndf2,), jnp.float32),
        "w3": jax.random.normal(k4, (1, ndf2), jnp.float32) * 0.1,         # Conv2d(2ndf, 1, 1, bias=False)
    }


def reference_forward(x_nchw, params):
    """Pure-JAX reference of the same math (1x1 convs as channel-major matmuls)."""
    N, C, H, W = x_nchw.shape
    x = jnp.transpose(x_nchw, (1, 0, 2, 3)).reshape(C, -1).astype(jnp.float32)
    h1 = _leaky(params["w1"] @ x + params["b1"][:, None])
    h2 = params["w2"] @ h1
    mean = jnp.mean(h2, axis=1, keepdims=True)
    var = jnp.var(h2, axis=1, keepdims=True)             # biased, as in BN forward
    y = _leaky((h2 - mean) * jax.lax.rsqrt(var + BN_EPS)
               * params["gamma"][:, None] + params["beta"][:, None])
    out = params["w3"] @ y
    return jnp.transpose(out.reshape(1, N, H, W), (1, 0, 2, 3))


if __name__ == "__main__":
    key = jax.random.PRNGKey(0)
    kx, kp = jax.random.split(key)

    N, C, H, W = 2, 4, 16, 16          # P = N*H*W = 512
    ndf = 64

    x = jax.random.normal(kx, (N, C, H, W), jnp.float32)
    params = init_params(kp, C, ndf)

    ref = jax.block_until_ready(reference_forward(x, params))

    # f32, small tile: exercises the multi-block accumulation and the 2-way split.
    out_small = jax.block_until_ready(pixel_discriminator(x, params, tile_p=128))
    assert out_small.shape == (N, 1, H, W), out_small.shape
    np.testing.assert_allclose(np.asarray(out_small), np.asarray(ref), rtol=1e-4, atol=1e-4)

    # f32, default (large) tile.
    out_big = jax.block_until_ready(pixel_discriminator(x, params))
    np.testing.assert_allclose(np.asarray(out_big), np.asarray(ref), rtol=1e-4, atol=1e-4)

    # bf16 inputs/weights (recommended traffic cut on v6e/v7x); stats & elementwise stay f32.
    out_bf16 = jax.block_until_ready(
        pixel_discriminator(x, params, tile_p=128, compute_dtype=jnp.bfloat16))
    assert out_bf16.shape == (N, 1, H, W)
    assert bool(jnp.all(jnp.isfinite(out_bf16)))

    print("KERNEL_OK")
</pallas_src>

<mosaic_0001>
module attributes {stable_mosaic.version = 11 : i64} {
  func.func @_stats_kernel(%arg0: i32, %arg1: i32, %arg2: memref<4x128xf32, #tpu.memory_space<vmem>>, %arg3: memref<64x4xf32, #tpu.memory_space<vmem>>, %arg4: memref<64x1xf32, #tpu.memory_space<vmem>>, %arg5: memref<128x64xf32, #tpu.memory_space<vmem>>, %arg6: memref<1x128x1xf32, #tpu.memory_space<vmem>>, %arg7: memref<1x128x1xf32, #tpu.memory_space<vmem>>) attributes {dimension_semantics = [#tpu.dimension_semantics<parallel>, #tpu.dimension_semantics<arbitrary>], iteration_bounds = array<i64: 2, 2>, scalar_prefetch = 0 : i64, scratch_operands = 0 : i64, tpu.core_type = #tpu.core_type<tc>, window_params = [{transform_indices = @transform_0, window_bounds = array<i64: 4, 128>}, {pipeline_mode = #tpu.pipeline_mode<synchronous>, transform_indices = @transform_1, window_bounds = array<i64: 64, 4>}, {pipeline_mode = #tpu.pipeline_mode<synchronous>, transform_indices = @transform_2, window_bounds = array<i64: 64, 1>}, {pipeline_mode = #tpu.pipeline_mode<synchronous>, transform_indices = @transform_3, window_bounds = array<i64: 128, 64>}, {transform_indices = @transform_4, window_bounds = array<i64: 1, 128, 1>}, {transform_indices = @transform_5, window_bounds = array<i64: 1, 128, 1>}]} {
    %c0_i32 = arith.constant 0 : i32
    %0 = arith.cmpi eq, %arg1, %c0_i32 : i32
    %1 = arith.extui %0 : i1 to i32
    %c0_i32_0 = arith.constant 0 : i32
    %2 = arith.cmpi ne, %1, %c0_i32_0 : i32
    scf.if %2 {
      %cst_25 = arith.constant 0.000000e+00 : f32
      %29 = vector.broadcast %cst_25 : f32 to vector<1x128x1xf32>
      %c0_26 = arith.constant 0 : index
      %c0_27 = arith.constant 0 : index
      %c0_28 = arith.constant 0 : index
      %30 = vector.load %arg6[%c0_26, %c0_27, %c0_28] : memref<1x128x1xf32, #tpu.memory_space<vmem>>, vector<1x128x1xf32>
      tpu.vector_store %arg6[%c0_26, %c0_27, %c0_28], %29 {strides = array<i32>} : memref<1x128x1xf32, #tpu.memory_space<vmem>>, vector<1x128x1xf32>,
      %cst_29 = arith.constant 0.000000e+00 : f32
      %31 = vector.broadcast %cst_29 : f32 to vector<1x128x1xf32>
      %c0_30 = arith.constant 0 : index
      %c0_31 = arith.constant 0 : index
      %c0_32 = arith.constant 0 : index
      %32 = vector.load %arg7[%c0_30, %c0_31, %c0_32] : memref<1x128x1xf32, #tpu.memory_space<vmem>>, vector<1x128x1xf32>
      tpu.vector_store %arg7[%c0_30, %c0_31, %c0_32], %31 {strides = array<i32>} : memref<1x128x1xf32, #tpu.memory_space<vmem>>, vector<1x128x1xf32>,
    } else {
    }
    %c0 = arith.constant 0 : index
    %c0_1 = arith.constant 0 : index
    %3 = vector.load %arg2[%c0, %c0_1] : memref<4x128xf32, #tpu.memory_space<vmem>>, vector<4x128xf32>
    %c0_2 = arith.constant 0 : index
    %c0_3 = arith.constant 0 : index
    %4 = vector.load %arg3[%c0_2, %c0_3] : memref<64x4xf32, #tpu.memory_space<vmem>>, vector<64x4xf32>
    %cst = arith.constant dense<0.000000e+00> : vector<64x128xf32>
    %5 = tpu.matmul %4, %3, %cst {dimension_numbers = #tpu.dot_dimension_numbers<[1], [0], [0], [1], [0, 0, 1, 1], [], []>} : vector<64x4xf32>, vector<4x128xf32>, vector<64x128xf32> -> vector<64x128xf32>
    %c0_4 = arith.constant 0 : index
    %c0_5 = arith.constant 0 : index
    %6 = vector.load %arg4[%c0_4, %c0_5] : memref<64x1xf32, #tpu.memory_space<vmem>>, vector<64x1xf32>
    %7 = vector.broadcast %6 : vector<64x1xf32> to vector<64x128xf32>
    %8 = arith.addf %5, %7 : vector<64x128xf32>
    %cst_6 = arith.constant 0.000000e+00 : f32
    %9 = vector.broadcast %cst_6 : f32 to vector<64x128xf32>
    %10 = arith.cmpf oge, %8, %9 : vector<64x128xf32>
    %cst_7 = arith.constant 2.000000e-01 : f32
    %11 = vector.broadcast %cst_7 : f32 to vector<64x128xf32>
    %12 = arith.mulf %11, %8 : vector<64x128xf32>
    %13 = arith.select %10, %8, %12 : vector<64x128xi1>, vector<64x128xf32>
    %c0_8 = arith.constant 0 : index
    %c0_9 = arith.constant 0 : index
    %14 = vector.load %arg5[%c0_8, %c0_9] : memref<128x64xf32, #tpu.memory_space<vmem>>, vector<128x64xf32>
    %cst_10 = arith.constant dense<0.000000e+00> : vector<128x128xf32>
    %15 = tpu.matmul %14, %13, %cst_10 {dimension_numbers = #tpu.dot_dimension_numbers<[1], [0], [0], [1], [0, 0, 1, 1], [], []>} : vector<128x64xf32>, vector<64x128xf32>, vector<128x128xf32> -> vector<128x128xf32>
    %c0_11 = arith.constant 0 : index
    %c0_12 = arith.constant 0 : index
    %c0_13 = arith.constant 0 : index
    %16 = vector.load %arg6[%c0_11, %c0_12, %c0_13] : memref<1x128x1xf32, #tpu.memory_space<vmem>>, vector<1x128x1xf32>
    %cst_14 = arith.constant dense<0.000000e+00> : vector<128xf32>
    %17 = vector.multi_reduction <add>, %15, %cst_14 [1] : vector<128x128xf32> to vector<128xf32>
    %18 = vector.shape_cast %17 : vector<128xf32> to vector<128x1xf32>
    %19 = vector.shape_cast %18 : vector<128x1xf32> to vector<1x128x1xf32>
    %20 = arith.addf %16, %19 : vector<1x128x1xf32>
    %c0_15 = arith.constant 0 : index
    %c0_16 = arith.constant 0 : index
    %c0_17 = arith.constant 0 : index
    %21 = vector.load %arg6[%c0_15, %c0_16, %c0_17] : memref<1x128x1xf32, #tpu.memory_space<vmem>>, vector<1x128x1xf32>
    tpu.vector_store %arg6[%c0_15, %c0_16, %c0_17], %20 {strides = array<i32>} : memref<1x128x1xf32, #tpu.memory_space<vmem>>, vector<1x128x1xf32>,
    %c0_18 = arith.constant 0 : index
    %c0_19 = arith.constant 0 : index
    %c0_20 = arith.constant 0 : index
    %22 = vector.load %arg7[%c0_18, %c0_19, %c0_20] : memref<1x128x1xf32, #tpu.memory_space<vmem>>, vector<1x128x1xf32>
    %23 = arith.mulf %15, %15 : vector<128x128xf32>
    %cst_21 = arith.constant dense<0.000000e+00> : vector<128xf32>
    %24 = vector.multi_reduction <add>, %23, %cst_21 [1] : vector<128x128xf32> to vector<128xf32>
    %25 = vector.shape_cast %24 : vector<128xf32> to vector<128x1xf32>
    %26 = vector.shape_cast %25 : vector<128x1xf32> to vector<1x128x1xf32>
    %27 = arith.addf %22, %26 : vector<1x128x1xf32>
    %c0_22 = arith.constant 0 : index
    %c0_23 = arith.constant 0 : index
    %c0_24 = arith.constant 0 : index
    %28 = vector.load %arg7[%c0_22, %c0_23, %c0_24] : memref<1x128x1xf32, #tpu.memory_space<vmem>>, vector<1x128x1xf32>
    tpu.vector_store %arg7[%c0_22, %c0_23, %c0_24], %27 {strides = array<i32>} : memref<1x128x1xf32, #tpu.memory_space<vmem>>, vector<1x128x1xf32>,
    return
  }
  func.func @transform_0(%arg0: i32, %arg1: i32) -> (i32, i32) {
    %c2_i32 = arith.constant 2 : i32
    %0 = arith.muli %arg0, %c2_i32 : i32
    %1 = arith.addi %0, %arg1 : i32
    %c0_i32 = arith.constant 0 : i32
    %c0_i32_0 = arith.constant 0 : i32
    return %c0_i32, %1 : i32, i32
  }
  func.func @transform_1(%arg0: i32, %arg1: i32) -> (i32, i32) {
    %c0_i32 = arith.constant 0 : i32
    %c0_i32_0 = arith.constant 0 : i32
    %c0_i32_1 = arith.constant 0 : i32
    return %c0_i32, %c0_i32_0 : i32, i32
  }
  func.func @transform_2(%arg0: i32, %arg1: i32) -> (i32, i32) {
    %c0_i32 = arith.constant 0 : i32
    %c0_i32_0 = arith.constant 0 : i32
    %c0_i32_1 = arith.constant 0 : i32
    return %c0_i32, %c0_i32_0 : i32, i32
  }
  func.func @transform_3(%arg0: i32, %arg1: i32) -> (i32, i32) {
    %c0_i32 = arith.constant 0 : i32
    %c0_i32_0 = arith.constant 0 : i32
    %c0_i32_1 = arith.constant 0 : i32
    return %c0_i32, %c0_i32_0 : i32, i32
  }
  func.func @transform_4(%arg0: i32, %arg1: i32) -> (i32, i32, i32) {
    %c0_i32 = arith.constant 0 : i32
    %c0_i32_0 = arith.constant 0 : i32
    %c0_i32_1 = arith.constant 0 : i32
    return %arg0, %c0_i32, %c0_i32_0 : i32, i32, i32
  }
  func.func @transform_5(%arg0: i32, %arg1: i32) -> (i32, i32, i32) {
    %c0_i32 = arith.constant 0 : i32
    %c0_i32_0 = arith.constant 0 : i32
    %c0_i32_1 = arith.constant 0 : i32
    return %arg0, %c0_i32, %c0_i32_0 : i32, i32, i32
  }
}

</mosaic_0001>

<bundles_post_ra>
// kernel: tpu_custom_call.1
= control target key start
LH: loop header
LB: loop body
LE: loop exit
PB: predicated region body
PF: predicated region fallthrough
CT: control target
= control target key end

     0   :  { %s1261_s18 = smov 0   ;;  %s1263_s19 = smov 0   ;;  %s1603_s0 = inlined_call_operand.vmem [shape: f32[4,512], index: 0, kind: input, shape index: {}]   ;;  %s1604_s1 = inlined_call_operand.vmem [shape: f32[64,4], index: 1, kind: input, shape index: {}]   ;;  %s1605_s2 = inlined_call_operand.vmem [shape: f32[64,1], index: 2, kind: input, shape index: {}]   ;;  %s1606_s3 = inlined_call_operand.vmem [shape: f32[128,64], index: 3, kind: input, shape index: {}]   ;;  %s1607_s4 = inlined_call_operand.vmem [shape: f32[2,128,1], index: 4, kind: output, shape index: {0}]   ;;  %s1608_s5 = inlined_call_operand.vmem [shape: f32[2,128,1], index: 5, kind: output, shape index: {1}]  }
   0x1   :  { %s1265_s20 = smov 0   ;;  %s1267_s21 = smov 0  }
   0x2   :  { %s1269_s22 = smov 0  }
   0x3 LB: > { %s25_s23 = sadd.s32 1, %s1219_s20  ;;  %s28_s24 = sadd.s32 1, %s1223_s21  ;;  %s1227_s22 = sphi %s1269_s22, %s16_s22   ;;  %s1223_s21 = sphi %s1267_s21, %s1612_s21   ;;  %s1219_s20 = sphi %s1265_s20, %s1611_s20   ;;  %s1215_s19 = sphi %s1263_s19, %s1610_s19   ;;  %s1211_s18 = sphi %s1261_s18, %s1609_s18  }
   0x4   : > { %p26_p0 = scmp.ge.s32.totalorder %s25_s23, 2  ;;  %p1005_p1 = scmp.ge.s32.totalorder %s1227_s22, 1 }
   0x5   : > { %p209_p2 = scmp.lt.s32.totalorder %s1227_s22, 5 }
   0x6   : > { %s1614_s23 = smov (%p26_p0, %s25_s23), 0  ;;  %s1616_s24 = smov (!%p26_p0, %s28_s24), %s1223_s21 }
   0x7   : > { %p210_p3 = pnand %p1005_p1, %p209_p2  ;;  %p30_p4 = scmp.ge.s32.totalorder %s1616_s24, 2 }
   0x8   : > { %s1006_s25 = sshll.u32 (!%p210_p3), %s1215_s19, 1  ;;  %p251_p5 = scmp.lt.s32.totalorder (!%p210_p3), %s1215_s19, 1 }
   0x9   : > { %s1618_s24 = smov (%p30_p4, %s1616_s24), 0  ;;  %213 = sbr.rel (%p210_p3) target bundleno = 666 (0x29a), region = 36 }
   0xa   : > { %s244_s26 = sadd.s32 (!%p210_p3), %s1211_s18, %s1006_s25  ;;  %p1012_p7 = scmp.ne.s32.totalorder (!%p210_p3), %s1211_s18, 0 }
   0xb   : > { %p245_p6 = scmp.lt.s32.totalorder (!%p210_p3), %s244_s26, 3 }
   0xe   : > { %s1620_s19 = smov (!%p251_p5, %s1215_s19), 1  ;;  %s1622_s26 = smov (!%p245_p6, %s244_s26), 3 }
   0xf   : > { %s1040_s27 = sshll.u32 %s1620_s19, 7  ;;  %s1007_s28 = sshll.u32 %s1622_s26, 2 }
  0x10   : > { %s1294_s6 = scalar_lea.vmem %s1607_s4, %s1040_s27  ;;  %s1299_s9 = scalar_lea.vmem %s1603_s0, %s1007_s28 }
  0x11   : > { %s1304_s12 = scalar_lea.vmem %s1608_s5, %s1040_s27  ;;  %264 = sbr.rel (%p1012_p7) target bundleno = 39 (0x27), region = 40 }
  0x16   : > { %vm265_vm0 = vcmask 7168   ;;  %v1229_v0 = vmov 0.0  }
  0x17   : > { %266 = vst.msk [vmem:[%s1294_s6] sm:$0xff] %vm265_vm0, %v1229_v0  ;;  %267 = vst.msk [vmem:[%s1294_s6 + $0x8] sm:$0xff] %vm265_vm0, %v1229_v0 }
  0x18   : > { %268 = vst.msk [vmem:[%s1294_s6 + $0x10] sm:$0xff] %vm265_vm0, %v1229_v0  ;;  %269 = vst.msk [vmem:[%s1294_s6 + $0x18] sm:$0xff] %vm265_vm0, %v1229_v0 }
  0x19   : > { %270 = vst.msk [vmem:[%s1294_s6 + $0x20] sm:$0xff] %vm265_vm0, %v1229_v0  ;;  %271 = vst.msk [vmem:[%s1294_s6 + $0x28] sm:$0xff] %vm265_vm0, %v1229_v0 }
  0x1a   : > { %272 = vst.msk [vmem:[%s1294_s6 + $0x30] sm:$0xff] %vm265_vm0, %v1229_v0  ;;  %273 = vst.msk [vmem:[%s1294_s6 + $0x38] sm:$0xff] %vm265_vm0, %v1229_v0 }
  0x1b   : > { %274 = vst.msk [vmem:[%s1294_s6 + $0x40] sm:$0xff] %vm265_vm0, %v1229_v0  ;;  %275 = vst.msk [vmem:[%s1294_s6 + $0x48] sm:$0xff] %vm265_vm0, %v1229_v0 }
  0x1c   : > { %276 = vst.msk [vmem:[%s1294_s6 + $0x50] sm:$0xff] %vm265_vm0, %v1229_v0  ;;  %277 = vst.msk [vmem:[%s1294_s6 + $0x58] sm:$0xff] %vm265_vm0, %v1229_v0 }
  0x1d   : > { %278 = vst.msk [vmem:[%s1294_s6 + $0x60] sm:$0xff] %vm265_vm0, %v1229_v0  ;;  %279 = vst.msk [vmem:[%s1294_s6 + $0x68] sm:$0xff] %vm265_vm0, %v1229_v0 }
  0x1e   : > { %280 = vst.msk [vmem:[%s1294_s6 + $0x70] sm:$0xff] %vm265_vm0, %v1229_v0  ;;  %281 = vst.msk [vmem:[%s1294_s6 + $0x78] sm:$0xff] %vm265_vm0, %v1229_v0 }
  0x1f   : > { %282 = vst.msk [vmem:[%s1304_s12] sm:$0xff] %vm265_vm0, %v1229_v0  ;;  %283 = vst.msk [vmem:[%s1304_s12 + $0x8] sm:$0xff] %vm265_vm0, %v1229_v0 }
  0x20   : > { %284 = vst.msk [vmem:[%s1304_s12 + $0x10] sm:$0xff] %vm265_vm0, %v1229_v0  ;;  %285 = vst.msk [vmem:[%s1304_s12 + $0x18] sm:$0xff] %vm265_vm0, %v1229_v0 }
  0x21   : > { %286 = vst.msk [vmem:[%s1304_s12 + $0x20] sm:$0xff] %vm265_vm0, %v1229_v0  ;;  %287 = vst.msk [vmem:[%s1304_s12 + $0x28] sm:$0xff] %vm265_vm0, %v1229_v0 }
  0x22   : > { %288 = vst.msk [vmem:[%s1304_s12 + $0x30] sm:$0xff] %vm265_vm0, %v1229_v0  ;;  %289 = vst.msk [vmem:[%s1304_s12 + $0x38] sm:$0xff] %vm265_vm0, %v1229_v0 }
  0x23   : > { %290 = vst.msk [vmem:[%s1304_s12 + $0x40] sm:$0xff] %vm265_vm0, %v1229_v0  ;;  %291 = vst.msk [vmem:[%s1304_s12 + $0x48] sm:$0xff] %vm265_vm0, %v1229_v0 }
  0x24   : > { %292 = vst.msk [vmem:[%s1304_s12 + $0x50] sm:$0xff] %vm265_vm0, %v1229_v0  ;;  %293 = vst.msk [vmem:[%s1304_s12 + $0x58] sm:$0xff] %vm265_vm0, %v1229_v0 }
  0x25   : > { %294 = vst.msk [vmem:[%s1304_s12 + $0x60] sm:$0xff] %vm265_vm0, %v1229_v0  ;;  %295 = vst.msk [vmem:[%s1304_s12 + $0x68] sm:$0xff] %vm265_vm0, %v1229_v0 }
  0x26   : > { %296 = vst.msk [vmem:[%s1304_s12 + $0x70] sm:$0xff] %vm265_vm0, %v1229_v0  ;;  %297 = vst.msk [vmem:[%s1304_s12 + $0x78] sm:$0xff] %vm265_vm0, %v1229_v0 }
  0x27 PF: > { %v298_v1 = vld [vmem:[%s1299_s9] sm:$0xf]  ;;  %vm380_vm1 = vcmask 1043456   ;;  %vm355_vm2 = vcmask 31744   ;;  %v300_v3 = vld [vmem:[%s1604_s1 + $0x8] sm:$0xff]  ;;  %v301_v4 = vld [vmem:[%s1604_s1 + $0x10] sm:$0xff] }
  0x28   : > { %v299_v2 = vld [vmem:[%s1604_s1] sm:$0xff]  ;;  %1075 = vmatprep.subr.msk.mxu0 %vm380_vm1, %v298_v1  ;;  %v1230_v5 = vmov 0   ;;  %v314_v6 = vld [vmem:[%s1605_s2 + $0x38] sm:$0xff]  ;;  %v312_v7 = vld [vmem:[%s1605_s2 + $0x28] sm:$0xff]  ;;  %vm529_vm3 = vcmask 523264   ;;  %vm787_vm12 = vcmask 7168  }
  0x29   : > { %1077 = vmatprep.mubr.msk.f32.mxu0 %vm355_vm2, %v299_v2  ;;  %1076 = vmatpush3.msk.msra.mxu0 %vm380_vm1, %v298_v1  ;;  %v302_v8 = vld [vmem:[%s1604_s1 + $0x18] sm:$0xff]  ;;  %v303_v9 = vld [vmem:[%s1604_s1 + $0x20] sm:$0xff]  ;;  %v313_v10 = vld [vmem:[%s1605_s2 + $0x30] sm:$0xff] }
  0x2a   : > { %1187 = vset.pattern.permute.xlu0 %v1230_v5  ;;  %1078 = vmatmul.mubr.msk.f32.vlgmr.msra.gmra.mxu0 %vm355_vm2, %v300_v3  ;;  %v311_v11 = vld [vmem:[%s1605_s2 + $0x20] sm:$0xff]  ;;  %v304_v12 = vld [vmem:[%s1604_s1 + $0x28] sm:$0xff]  ;;  %v305_v13 = vld [vmem:[%s1604_s1 + $0x30] sm:$0xff] }
  0x2b   : > { %1188 = vset.pattern.permute.xlu1 %v1230_v5  ;;  %1080 = vmatprep.mubr.msk.f32.mxu0 %vm355_vm2, %v301_v4  ;;  %v310_v14 = vld [vmem:[%s1605_s2 + $0x18] sm:$0xff]  ;;  %v309_v15 = vld [vmem:[%s1605_s2 + $0x10] sm:$0xff]  ;;  %v308_v17 = vld [vmem:[%s1605_s2 + $0x8] sm:$0xff] }
  0x2c   : > { %352 = vperm.xlu0 %1187, %v314_v6   ;;  %342 = vperm.xlu1 %1188, %v312_v7   ;;  %v306_v16 = vld [vmem:[%s1604_s1 + $0x38] sm:$0xff]  ;;  %v307_v18 = vld [vmem:[%s1605_s2] sm:$0xff]  ;;  %v519_v20 = vld [vmem:[%s1606_s3 + $0x30] sm:$0xff] }
  0x2d   : > { %v513_v19 = vld [vmem:[%s1606_s3] sm:$0xff]  ;;  %1114 = vmatprep.mubr.msk.f32.mxu1 %vm529_vm3, %v519_v20  ;;  %v514_v61 = vld [vmem:[%s1606_s3 + $0x8] sm:$0xff]  ;;  %v520_v62 = vld [vmem:[%s1606_s3 + $0x38] sm:$0xff] }
  0x2e   : > { %1081 = vmatmul.mubr.msk.f32.gmra.mxu0 %vm355_vm2, %v302_v8  ;;  %v515_v63 = vld [vmem:[%s1606_s3 + $0x10] sm:$0xff]  ;;  %v521_v0 = vld [vmem:[%s1606_s3 + $0x40] sm:$0xff]  ;;  %v516_v1 = vld [vmem:[%s1606_s3 + $0x18] sm:$0xff] }
  0x2f   : > { %1083 = vmatprep.mubr.msk.f32.mxu0 %vm355_vm2, %v303_v9  ;;  %v522_v2 = vld [vmem:[%s1606_s3 + $0x48] sm:$0xff]  ;;  %v517_v3 = vld [vmem:[%s1606_s3 + $0x20] sm:$0xff]  ;;  %v523_v4 = vld [vmem:[%s1606_s3 + $0x50] sm:$0xff] }
  0x30   : > { %347 = vperm.xlu0 %1187, %v313_v10   ;;  %337 = vperm.xlu1 %1188, %v311_v11   ;;  %v518_v5 = vld [vmem:[%s1606_s3 + $0x28] sm:$0xff]  ;;  %v524_v6 = vld [vmem:[%s1606_s3 + $0x58] sm:$0xff]  ;;  %v525_v7 = vld [vmem:[%s1606_s3 + $0x60] sm:$0xff] }
  0x31   : > { %v526_v8 = vld [vmem:[%s1606_s3 + $0x68] sm:$0xff]  ;;  %v527_v9 = vld [vmem:[%s1606_s3 + $0x70] sm:$0xff]  ;;  %v528_v10 = vld [vmem:[%s1606_s3 + $0x78] sm:$0xff] }
  0x32   : > { %1084 = vmatmul.mubr.msk.f32.gmra.mxu0 %vm355_vm2, %v304_v12 }
  0x33   : > { %1086 = vmatprep.mubr.msk.f32.mxu0 %vm355_vm2, %v305_v13 }
  0x34   : > { %332 = vperm.xlu0 %1187, %v310_v14   ;;  %327 = vperm.xlu1 %1188, %v309_v15  }
  0x36   : > { %1087 = vmatmul.mubr.msk.f32.gmra.mxu0 %vm355_vm2, %v306_v16 }
  0x37   : > { %1105 = vmatprep.mubr.msk.f32.mxu0 %vm529_vm3, %v513_v19 }
  0x38   : > { %322 = vperm.xlu0 %1187, %v308_v17   ;;  %317 = vperm.xlu1 %1188, %v307_v18  }
  0xa7   : > { %v353_v21 = vpop.permute.xlu0 %352  ;;  %v343_v23 = vpop.permute.xlu1 %342 }
  0xab   : > { %v348_v26 = vpop.permute.xlu0 %347  ;;  %v338_v28 = vpop.permute.xlu1 %337 }
  0xaf   : > { %v333_v31 = vpop.permute.xlu0 %332  ;;  %v328_v35 = vpop.permute.xlu1 %327 }
  0xb3   : > { %v323_v44 = vpop.permute.xlu0 %322  ;;  %v318_v48 = vpop.permute.xlu1 %317 }
  0xea   : > { %v1079_v22 = vpop.f32.mrf.mxu0 }
  0xeb   : > { %v456_v49 = vadd.f32 %v1079_v22, %v323_v44  ;;  %v724_v44 = vld [vmem:[%s1294_s6 + $0x8] sm:$0xff] }
  0xec   : > { %v450_v24 = vpop.f32.mrf.mxu0 }
  0xed   : > { %v451_v52 = vadd.f32 %v450_v24, %v318_v48  ;;  %v498_v55 = vmul.f32 0.2, %v456_v49  ;;  %vm490_vm10 = vcmp.ge.f32.partialorder %v456_v49, 0.0 }
  0xee   : > { %v1082_v25 = vpop.f32.mrf.mxu0 }
  0xef   : > { %v466_v40 = vadd.f32 %v1082_v25, %v333_v31  ;;  %v497_v57 = vmul.f32 0.2, %v451_v52  ;;  %vm489_vm11 = vcmp.ge.f32.partialorder %v451_v52, 0.0  ;;  %v506_v59 = vsel %vm490_vm10, %v456_v49, %v498_v55  ;;  %v729_v49 = vld [vmem:[%s1294_s6 + $0x30] sm:$0xff]  ;;  %v805_v55 = vld [vmem:[%s1304_s12 + $0x8] sm:$0xff] }
  0xf0   : > { %v460_v27 = vpop.f32.mrf.mxu0 }
  0xf1   : > { %v461_v45 = vadd.f32 %v460_v27, %v328_v35  ;;  %v500_v50 = vmul.f32 0.2, %v466_v40  ;;  %vm492_vm8 = vcmp.ge.f32.partialorder %v466_v40, 0.0  ;;  %v505_v60 = vsel %vm489_vm11, %v451_v52, %v497_v57 }
  0xf2   : > { %v1085_v29 = vpop.f32.mrf.mxu0 }
  0xf3   : > { %v476_v33 = vadd.f32 %v1085_v29, %v343_v23  ;;  %v499_v53 = vmul.f32 0.2, %v461_v45  ;;  %vm491_vm9 = vcmp.ge.f32.partialorder %v461_v45, 0.0  ;;  %v508_v56 = vsel %vm492_vm8, %v466_v40, %v500_v50  ;;  %v723_v50 = vld [vmem:[%s1294_s6] sm:$0xff] }
  0xf4   : > { %v470_v30 = vpop.f32.mrf.mxu0 }
  0xf5   : > { %v471_v37 = vadd.f32 %v470_v30, %v338_v28  ;;  %v502_v41 = vmul.f32 0.2, %v476_v33  ;;  %vm494_vm6 = vcmp.ge.f32.partialorder %v476_v33, 0.0  ;;  %v507_v58 = vsel %vm491_vm9, %v461_v45, %v499_v53 }
  0xf6   : > { %v1088_v32 = vpop.f32.mrf.mxu0 }
  0xf7   : > { %v486_v34 = vadd.f32 %v1088_v32, %v353_v21  ;;  %v501_v46 = vmul.f32 0.2, %v471_v37  ;;  %vm493_vm7 = vcmp.ge.f32.partialorder %v471_v37, 0.0  ;;  %v510_v51 = vsel %vm494_vm6, %v476_v33, %v502_v41 }
  0xf8   : > { %v480_v36 = vpop.f32.mrf.mxu0 }
  0xf9   : > { %vm496_vm4 = vcmp.ge.f32.partialorder %v486_v34, 0.0  ;;  %v504_v38 = vmul.f32 0.2, %v486_v34  ;;  %v481_v39 = vadd.f32 %v480_v36, %v348_v26  ;;  %v509_v54 = vsel %vm493_vm7, %v471_v37, %v501_v46 }
  0xfb   : > { %vm495_vm5 = vcmp.ge.f32.partialorder %v481_v39, 0.0  ;;  %v503_v42 = vmul.f32 0.2, %v481_v39  ;;  %v512_v43 = vsel %vm496_vm4, %v486_v34, %v504_v38 }
  0xfc   : > { %1089 = vmatprep.subr.mxu0 %v512_v43  ;;  %1129 = vmatprep.subr.mxu1 %v512_v43 }
  0xfd   : > { %1090 = vmatpush3.msra.mxu0 %v512_v43  ;;  %1137 = vmatpush3.msra.mxu1 %v512_v43  ;;  %v511_v47 = vsel %vm495_vm5, %v481_v39, %v503_v42  ;;  %v730_v43 = vld [vmem:[%s1294_s6 + $0x38] sm:$0xff] }
  0xfe   : > { %1091 = vmatprep.subr.mxu0 %v511_v47  ;;  %1130 = vmatprep.subr.mxu1 %v511_v47 }
  0xff   : > { %1092 = vmatpush3.msra.mxu0 %v511_v47  ;;  %1138 = vmatpush3.msra.mxu1 %v511_v47 }
 0x100   : > { %1093 = vmatprep.subr.mxu0 %v510_v51  ;;  %1131 = vmatprep.subr.mxu1 %v510_v51 }
 0x101   : > { %1094 = vmatpush3.msra.mxu0 %v510_v51  ;;  %1139 = vmatpush3.msra.mxu1 %v510_v51 }
 0x102   : > { %1095 = vmatprep.subr.mxu0 %v509_v54  ;;  %1132 = vmatprep.subr.mxu1 %v509_v54 }
 0x103   : > { %1096 = vmatpush3.msra.mxu0 %v509_v54  ;;  %1140 = vmatpush3.msra.mxu1 %v509_v54 }
 0x104   : > { %1097 = vmatprep.subr.mxu0 %v508_v56  ;;  %1133 = vmatprep.subr.mxu1 %v508_v56 }
 0x105   : > { %1098 = vmatpush3.msra.mxu0 %v508_v56  ;;  %1141 = vmatpush3.msra.mxu1 %v508_v56  ;;  %v804_v56 = vld [vmem:[%s1304_s12] sm:$0xff] }
 0x106   : > { %1099 = vmatprep.subr.mxu0 %v507_v58  ;;  %1134 = vmatprep.subr.mxu1 %v507_v58 }
 0x107   : > { %1100 = vmatpush3.msra.mxu0 %v507_v58  ;;  %1142 = vmatpush3.msra.mxu1 %v507_v58 }
 0x108   : > { %1101 = vmatprep.subr.mxu0 %v506_v59  ;;  %1135 = vmatprep.subr.mxu1 %v506_v59 }
 0x109   : > { %1102 = vmatpush3.msra.mxu0 %v506_v59  ;;  %1143 = vmatpush3.msra.mxu1 %v506_v59 }
 0x10a   : > { %1103 = vmatprep.subr.mxu0 %v505_v60  ;;  %1136 = vmatprep.subr.mxu1 %v505_v60 }
 0x10b   : > { %1104 = vmatpush3.msra.mxu0 %v505_v60  ;;  %1144 = vmatpush3.msra.mxu1 %v505_v60 }
 0x10c   : > { %1106 = vmatmul.mubr.msk.f32.vlgmr.msra.gmra.mxu0 %vm529_vm3, %v514_v61  ;;  %1115 = vmatmul.mubr.msk.f32.vlgmr.msra.gmra.mxu1 %vm529_vm3, %v520_v62  ;;  %v811_v61 = vld [vmem:[%s1304_s12 + $0x38] sm:$0xff]  ;;  %v810_v62 = vld [vmem:[%s1304_s12 + $0x30] sm:$0xff] }
 0x10d   : > { %1108 = vmatprep.mubr.msk.f32.mxu0 %vm529_vm3, %v515_v63  ;;  %1117 = vmatprep.mubr.msk.f32.mxu1 %vm529_vm3, %v521_v0 }
 0x110   : > { %1109 = vmatmul.mubr.msk.f32.gmra.mxu0 %vm529_vm3, %v516_v1  ;;  %1118 = vmatmul.mubr.msk.f32.gmra.mxu1 %vm529_vm3, %v522_v2 }
 0x111   : > { %1111 = vmatprep.mubr.msk.f32.mxu0 %vm529_vm3, %v517_v3  ;;  %1120 = vmatprep.mubr.msk.f32.mxu1 %vm529_vm3, %v523_v4  ;;  %v731_v3 = vld [vmem:[%s1294_s6 + $0x40] sm:$0xff]  ;;  %v726_v4 = vld [vmem:[%s1294_s6 + $0x18] sm:$0xff] }
 0x114   : > { %1112 = vmatmul.mubr.msk.f32.gmra.mxu0 %vm529_vm3, %v518_v5  ;;  %1121 = vmatmul.mubr.msk.f32.gmra.mxu1 %vm529_vm3, %v524_v6 }
 0x115   : > { %1123 = vmatprep.mubr.msk.f32.mxu1 %vm529_vm3, %v525_v7 }
 0x118   : > { %1124 = vmatmul.mubr.msk.f32.gmra.mxu1 %vm529_vm3, %v526_v8 }
 0x119   : > { %1126 = vmatprep.mubr.msk.f32.mxu1 %vm529_vm3, %v527_v9  ;;  %v732_v9 = vld [vmem:[%s1294_s6 + $0x48] sm:$0xff] }
 0x11c   : > { %1127 = vmatmul.mubr.msk.f32.gmra.mxu1 %vm529_vm3, %v528_v10  ;;  %v806_v10 = vld [vmem:[%s1304_s12 + $0x10] sm:$0xff] }
 0x1cc   : > { %v1107_v11 = vpop.f32.mrf.mxu0  ;;  %v1116_v12 = vpop.f32.mrf.mxu1 }
 0x1cd   : > { %753 = vadd.xlane.f32.xlu0 %v1116_v12  ;;  %741 = vadd.xlane.f32.xlu1 %v1107_v11  ;;  %v821_v15 = vmul.f32 %v1107_v11, %v1107_v11  ;;  %v827_v18 = vmul.f32 %v1116_v12, %v1116_v12 }
 0x1ce   : > { %v644_v13 = vpop.f32.mrf.mxu0  ;;  %v674_v14 = vpop.f32.mrf.mxu1 }
 0x1cf   : > { %v820_v16 = vmul.f32 %v644_v13, %v644_v13  ;;  %v826_v19 = vmul.f32 %v674_v14, %v674_v14 }
 0x1d0   : > { %v1119_v17 = vpop.f32.mrf.mxu1  ;;  %v1110_v20 = vpop.f32.mrf.mxu0 }
 0x1d1   : > { %751 = vadd.xlane.f32.xlu1 %v674_v14  ;;  %739 = vadd.xlane.f32.xlu0 %v644_v13  ;;  %v823_v28 = vmul.f32 %v1110_v20, %v1110_v20  ;;  %v829_v30 = vmul.f32 %v1119_v17, %v1119_v17 }
 0x1d2   : > { %v684_v21 = vpop.f32.mrf.mxu1  ;;  %v654_v22 = vpop.f32.mrf.mxu0 }
 0x1d3   : > { %v822_v23 = vmul.f32 %v654_v22, %v654_v22  ;;  %v828_v25 = vmul.f32 %v684_v21, %v684_v21 }
 0x1d4   : > { %v1113_v24 = vpop.f32.mrf.mxu0  ;;  %v1122_v27 = vpop.f32.mrf.mxu1 }
 0x1d5   : > { %838 = vadd.xlane.f32.xlu0 %v821_v15  ;;  %836 = vadd.xlane.f32.xlu1 %v820_v16  ;;  %v825_v35 = vmul.f32 %v1113_v24, %v1113_v24  ;;  %v831_v38 = vmul.f32 %v1122_v27, %v1122_v27  ;;  %v725_v15 = vld [vmem:[%s1294_s6 + $0x10] sm:$0xff]  ;;  %v812_v16 = vld [vmem:[%s1304_s12 + $0x40] sm:$0xff] }
 0x1d6   : > { %v664_v26 = vpop.f32.mrf.mxu0  ;;  %v694_v29 = vpop.f32.mrf.mxu1 }
 0x1d7   : > { %v824_v31 = vmul.f32 %v664_v26, %v664_v26  ;;  %v830_v32 = vmul.f32 %v694_v29, %v694_v29 }
 0x1d8   : > { %v1125_v33 = vpop.f32.mrf.mxu1 }
 0x1d9   : > { %850 = vadd.xlane.f32.xlu0 %v827_v18  ;;  %848 = vadd.xlane.f32.xlu1 %v826_v19  ;;  %v833_v41 = vmul.f32 %v1125_v33, %v1125_v33 }
 0x1da   : > { %v704_v34 = vpop.f32.mrf.mxu1 }
 0x1db   : > { %v832_v36 = vmul.f32 %v704_v34, %v704_v34 }
 0x1dc   : > { %v1128_v37 = vpop.f32.mrf.mxu1 }
 0x1dd   : > { %755 = vadd.xlane.f32.xlu1 %v684_v21  ;;  %745 = vadd.xlane.f32.xlu0 %v1110_v20  ;;  %v835_v42 = vmul.f32 %v1128_v37, %v1128_v37  ;;  %v807_v21 = vld [vmem:[%s1304_s12 + $0x18] sm:$0xff] }
 0x1de   : > { %v714_v39 = vpop.f32.mrf.mxu1 }
 0x1df   : > { %v834_v40 = vmul.f32 %v714_v39, %v714_v39 }
 0x1e1   : > { %757 = vadd.xlane.f32.xlu0 %v1119_v17  ;;  %840 = vadd.xlane.f32.xlu1 %v822_v23 }
 0x1e5   : > { %743 = vadd.xlane.f32.xlu0 %v654_v22  ;;  %852 = vadd.xlane.f32.xlu1 %v828_v25  ;;  %v727_v22 = vld [vmem:[%s1294_s6 + $0x20] sm:$0xff] }
 0x1e9   : > { %842 = vadd.xlane.f32.xlu0 %v823_v28  ;;  %747 = vadd.xlane.f32.xlu1 %v664_v26  ;;  %v733_v28 = vld [vmem:[%s1294_s6 + $0x50] sm:$0xff] }
 0x1ed   : > { %854 = vadd.xlane.f32.xlu0 %v829_v30  ;;  %759 = vadd.xlane.f32.xlu1 %v694_v29 }
 0x1f1   : > { %749 = vadd.xlane.f32.xlu0 %v1113_v24  ;;  %844 = vadd.xlane.f32.xlu1 %v824_v31 }
 0x1f5   : > { %761 = vadd.xlane.f32.xlu0 %v1122_v27  ;;  %856 = vadd.xlane.f32.xlu1 %v830_v32  ;;  %v813_v27 = vld [vmem:[%s1304_s12 + $0x48] sm:$0xff] }
 0x1f9   : > { %846 = vadd.xlane.f32.xlu0 %v825_v35  ;;  %763 = vadd.xlane.f32.xlu1 %v704_v34  ;;  %v808_v34 = vld [vmem:[%s1304_s12 + $0x20] sm:$0xff] }
 0x1fd   : > { %858 = vadd.xlane.f32.xlu0 %v831_v38  ;;  %860 = vadd.xlane.f32.xlu1 %v832_v36 }
 0x201   : > { %765 = vadd.xlane.f32.xlu0 %v1125_v33  ;;  %767 = vadd.xlane.f32.xlu1 %v714_v39  ;;  %v728_v33 = vld [vmem:[%s1294_s6 + $0x28] sm:$0xff]  ;;  %v734_v39 = vld [vmem:[%s1294_s6 + $0x58] sm:$0xff] }
 0x205   : > { %862 = vadd.xlane.f32.xlu0 %v833_v41  ;;  %864 = vadd.xlane.f32.xlu1 %v834_v40  ;;  %v814_v40 = vld [vmem:[%s1304_s12 + $0x50] sm:$0xff] }
 0x209   : > { %769 = vadd.xlane.f32.xlu0 %v1128_v37 }
 0x20d   : > { %866 = vadd.xlane.f32.xlu0 %v835_v42 }
 0x256   : > { %v754_v45 = vpop.xlane.xlu0 %753  ;;  %v742_v46 = vpop.xlane.xlu1 %741 }
 0x257   : > { %v778_v47 = vadd.f32 %v754_v45, %v730_v43  ;;  %v772_v48 = vadd.f32 %v742_v46, %v724_v44  ;;  %v809_v45 = vld [vmem:[%s1304_s12 + $0x28] sm:$0xff]  ;;  %v735_v46 = vld [vmem:[%s1294_s6 + $0x60] sm:$0xff] }
 0x259   : > { %795 = vst.msk [vmem:[%s1294_s6 + $0x38] sm:$0xff] %vm787_vm12, %v778_v47  ;;  %789 = vst.msk [vmem:[%s1294_s6 + $0x8] sm:$0xff] %vm787_vm12, %v772_v48 }
 0x25a   : > { %v752_v51 = vpop.xlane.xlu1 %751  ;;  %v740_v52 = vpop.xlane.xlu0 %739 }
 0x25b   : > { %v777_v53 = vadd.f32 %v752_v51, %v729_v49  ;;  %v771_v54 = vadd.f32 %v740_v52, %v723_v50  ;;  %v815_v51 = vld [vmem:[%s1304_s12 + $0x58] sm:$0xff]  ;;  %v816_v52 = vld [vmem:[%s1304_s12 + $0x60] sm:$0xff] }
 0x25d   : > { %794 = vst.msk [vmem:[%s1294_s6 + $0x30] sm:$0xff] %vm787_vm12, %v777_v53  ;;  %788 = vst.msk [vmem:[%s1294_s6] sm:$0xff] %vm787_vm12, %v771_v54 }
 0x25e   : > { %v839_v57 = vpop.xlane.xlu0 %838  ;;  %v837_v58 = vpop.xlane.xlu1 %836 }
 0x25f   : > { %v869_v59 = vadd.f32 %v839_v57, %v805_v55  ;;  %v868_v60 = vadd.f32 %v837_v58, %v804_v56  ;;  %v736_v57 = vld [vmem:[%s1294_s6 + $0x68] sm:$0xff]  ;;  %v737_v58 = vld [vmem:[%s1294_s6 + $0x70] sm:$0xff] }
 0x261   : > { %885 = vst.msk [vmem:[%s1304_s12 + $0x8] sm:$0xff] %vm787_vm12, %v869_v59  ;;  %884 = vst.msk [vmem:[%s1304_s12] sm:$0xff] %vm787_vm12, %v868_v60 }
 0x262   : > { %v851_v63 = vpop.xlane.xlu0 %850  ;;  %v849_v0 = vpop.xlane.xlu1 %848 }
 0x263   : > { %v875_v1 = vadd.f32 %v851_v63, %v811_v61  ;;  %v874_v2 = vadd.f32 %v849_v0, %v810_v62  ;;  %v817_v63 = vld [vmem:[%s1304_s12 + $0x68] sm:$0xff]  ;;  %v818_v0 = vld [vmem:[%s1304_s12 + $0x70] sm:$0xff] }
 0x265   : > { %891 = vst.msk [vmem:[%s1304_s12 + $0x38] sm:$0xff] %vm787_vm12, %v875_v1  ;;  %890 = vst.msk [vmem:[%s1304_s12 + $0x30] sm:$0xff] %vm787_vm12, %v874_v2 }
 0x266   : > { %v756_v5 = vpop.xlane.xlu1 %755  ;;  %v746_v6 = vpop.xlane.xlu0 %745 }
 0x267   : > { %v779_v7 = vadd.f32 %v756_v5, %v731_v3  ;;  %v774_v8 = vadd.f32 %v746_v6, %v726_v4  ;;  %v738_v5 = vld [vmem:[%s1294_s6 + $0x78] sm:$0xff] }
 0x269   : > { %796 = vst.msk [vmem:[%s1294_s6 + $0x40] sm:$0xff] %vm787_vm12, %v779_v7  ;;  %791 = vst.msk [vmem:[%s1294_s6 + $0x18] sm:$0xff] %vm787_vm12, %v774_v8  ;;  %v819_v8 = vld [vmem:[%s1304_s12 + $0x78] sm:$0xff] }
 0x26a   : > { %v758_v11 = vpop.xlane.xlu0 %757  ;;  %v841_v12 = vpop.xlane.xlu1 %840 }
 0x26b   : > { %v780_v13 = vadd.f32 %v758_v11, %v732_v9  ;;  %v870_v14 = vadd.f32 %v841_v12, %v806_v10 }
 0x26d   : > { %797 = vst.msk [vmem:[%s1294_s6 + $0x48] sm:$0xff] %vm787_vm12, %v780_v13  ;;  %886 = vst.msk [vmem:[%s1304_s12 + $0x10] sm:$0xff] %vm787_vm12, %v870_v14 }
 0x26e   : > { %v744_v17 = vpop.xlane.xlu0 %743  ;;  %v853_v18 = vpop.xlane.xlu1 %852 }
 0x26f   : > { %v773_v19 = vadd.f32 %v744_v17, %v725_v15  ;;  %v876_v20 = vadd.f32 %v853_v18, %v812_v16 }
 0x271   : > { %790 = vst.msk [vmem:[%s1294_s6 + $0x10] sm:$0xff] %vm787_vm12, %v773_v19  ;;  %892 = vst.msk [vmem:[%s1304_s12 + $0x40] sm:$0xff] %vm787_vm12, %v876_v20 }
 0x272   : > { %v843_v23 = vpop.xlane.xlu0 %842  ;;  %v748_v24 = vpop.xlane.xlu1 %747 }
 0x273   : > { %v871_v25 = vadd.f32 %v843_v23, %v807_v21  ;;  %v775_v26 = vadd.f32 %v748_v24, %v727_v22 }
 0x275   : > { %887 = vst.msk [vmem:[%s1304_s12 + $0x18] sm:$0xff] %vm787_vm12, %v871_v25  ;;  %792 = vst.msk [vmem:[%s1294_s6 + $0x20] sm:$0xff] %vm787_vm12, %v775_v26 }
 0x276   : > { %v855_v29 = vpop.xlane.xlu0 %854  ;;  %v760_v30 = vpop.xlane.xlu1 %759 }
 0x277   : > { %v877_v31 = vadd.f32 %v855_v29, %v813_v27  ;;  %v781_v32 = vadd.f32 %v760_v30, %v733_v28 }
 0x279   : > { %893 = vst.msk [vmem:[%s1304_s12 + $0x48] sm:$0xff] %vm787_vm12, %v877_v31  ;;  %798 = vst.msk [vmem:[%s1294_s6 + $0x50] sm:$0xff] %vm787_vm12, %v781_v32 }
 0x27a   : > { %v750_v35 = vpop.xlane.xlu0 %749  ;;  %v845_v36 = vpop.xlane.xlu1 %844 }
 0x27b   : > { %v776_v37 = vadd.f32 %v750_v35, %v728_v33  ;;  %v872_v38 = vadd.f32 %v845_v36, %v808_v34 }
 0x27d   : > { %793 = vst.msk [vmem:[%s1294_s6 + $0x28] sm:$0xff] %vm787_vm12, %v776_v37  ;;  %888 = vst.msk [vmem:[%s1304_s12 + $0x20] sm:$0xff] %vm787_vm12, %v872_v38 }
 0x27e   : > { %v762_v41 = vpop.xlane.xlu0 %761  ;;  %v857_v42 = vpop.xlane.xlu1 %856 }
 0x27f   : > { %v782_v43 = vadd.f32 %v762_v41, %v734_v39  ;;  %v878_v44 = vadd.f32 %v857_v42, %v814_v40 }
 0x281   : > { %799 = vst.msk [vmem:[%s1294_s6 + $0x58] sm:$0xff] %vm787_vm12, %v782_v43  ;;  %894 = vst.msk [vmem:[%s1304_s12 + $0x50] sm:$0xff] %vm787_vm12, %v878_v44 }
 0x282   : > { %v847_v47 = vpop.xlane.xlu0 %846  ;;  %v764_v48 = vpop.xlane.xlu1 %763 }
 0x283   : > { %v873_v49 = vadd.f32 %v847_v47, %v809_v45  ;;  %v783_v50 = vadd.f32 %v764_v48, %v735_v46 }
 0x285   : > { %889 = vst.msk [vmem:[%s1304_s12 + $0x28] sm:$0xff] %vm787_vm12, %v873_v49  ;;  %800 = vst.msk [vmem:[%s1294_s6 + $0x60] sm:$0xff] %vm787_vm12, %v783_v50 }
 0x286   : > { %v859_v53 = vpop.xlane.xlu0 %858  ;;  %v861_v54 = vpop.xlane.xlu1 %860 }
 0x287   : > { %v879_v55 = vadd.f32 %v859_v53, %v815_v51  ;;  %v880_v56 = vadd.f32 %v861_v54, %v816_v52 }
 0x289   : > { %895 = vst.msk [vmem:[%s1304_s12 + $0x58] sm:$0xff] %vm787_vm12, %v879_v55  ;;  %896 = vst.msk [vmem:[%s1304_s12 + $0x60] sm:$0xff] %vm787_vm12, %v880_v56 }
 0x28a   : > { %v766_v59 = vpop.xlane.xlu0 %765  ;;  %v768_v60 = vpop.xlane.xlu1 %767 }
 0x28b   : > { %v784_v61 = vadd.f32 %v766_v59, %v736_v57  ;;  %v785_v62 = vadd.f32 %v768_v60, %v737_v58 }
 0x28d   : > { %801 = vst.msk [vmem:[%s1294_s6 + $0x68] sm:$0xff] %vm787_vm12, %v784_v61  ;;  %802 = vst.msk [vmem:[%s1294_s6 + $0x70] sm:$0xff] %vm787_vm12, %v785_v62 }
 0x28e   : > { %v863_v1 = vpop.xlane.xlu0 %862  ;;  %v865_v2 = vpop.xlane.xlu1 %864 }
 0x28f   : > { %v881_v3 = vadd.f32 %v863_v1, %v817_v63  ;;  %v882_v4 = vadd.f32 %v865_v2, %v818_v0 }
 0x291   : > { %897 = vst.msk [vmem:[%s1304_s12 + $0x68] sm:$0xff] %vm787_vm12, %v881_v3  ;;  %898 = vst.msk [vmem:[%s1304_s12 + $0x70] sm:$0xff] %vm787_vm12, %v882_v4 }
 0x292   : > { %v770_v6 = vpop.xlane.xlu0 %769 }
 0x293   : > { %v786_v7 = vadd.f32 %v770_v6, %v738_v5 }
 0x295   : > { %803 = vst.msk [vmem:[%s1294_s6 + $0x78] sm:$0xff] %vm787_vm12, %v786_v7 }
 0x296   : > { %v867_v9 = vpop.xlane.xlu0 %866 }
 0x297   : > { %v883_v10 = vadd.f32 %v867_v9, %v819_v8 }
 0x299   : > { %899 = vst.msk [vmem:[%s1304_s12 + $0x78] sm:$0xff] %vm787_vm12, %v883_v10 }
 0x29a PF: > { %s16_s22 = sadd.s32 1, %s1227_s22   ;;  %s1609_s18 = smov %s1219_s20 }
 0x29b   : > { %p13_p8 = scmp.ge.s32.totalorder %s16_s22, 6   ;;  %s1610_s19 = smov %s1223_s21 }
 0x29c   : > { %s1611_s20 = smov %s1614_s23  ;;  %s1612_s21 = smov %s1618_s24 }
 0x29d   :  { %15 = sbr.rel (!%p13_p8) target bundleno = 3 (0x3), region = 82 }

</bundles_post_ra>
